<compile_context>
chip_gen: v5e
topology: v5e:2x2
jax: 0.10.0
libtpu: 0.0.40
codegen_flags: <defaults>
</compile_context>

<pallas_src>
import jax
import jax.numpy as jnp
from jax.experimental import pallas as pl
from jax.experimental.pallas import tpu as pltpu

INPUT_SIZE = 1
LAYER_SIZE = 2
OUTPUT_SIZE = 1

LANE = 128
SUBLANE = 8


def mlp_kernel(w1_ref, b1_ref, w2_ref, b2_ref, x_ref, o_ref):
    """x_ref: (tile_rows, 128) f32 VMEM block; weights/biases are SMEM scalars."""
    x = x_ref[...]
    # Start the accumulator at the output bias (scalar broadcast from SMEM).
    acc = jnp.full_like(x, b2_ref[0, 0])
    # LAYER_SIZE == 2: fully unrolled at trace time, pure VPU mul/add/max.
    for j in range(LAYER_SIZE):
        h_j = jnp.maximum(x * w1_ref[0, j] + b1_ref[0, j], 0.0)  # relu(layer1)
        acc = acc + h_j * w2_ref[j, 0]                           # layer2 contribution
    o_ref[...] = acc.astype(o_ref.dtype)


def _round_up(n, m):
    return (n + m - 1) // m * m


def neural_network_forward(x, w1, b1, w2, b2, *, tile_rows=4096):
    """Pallas forward of Linear(1,2) -> ReLU -> Linear(2,1).

    x:  (B, INPUT_SIZE) float32
    w1: (INPUT_SIZE, LAYER_SIZE), b1: (1, LAYER_SIZE)
    w2: (LAYER_SIZE, OUTPUT_SIZE), b2: (1, OUTPUT_SIZE)
    returns (B, OUTPUT_SIZE) in x's dtype.
    """
    B = x.shape[0]
    assert x.shape == (B, INPUT_SIZE)
    assert tile_rows % SUBLANE == 0

    orig_dtype = x.dtype
    xf = x.astype(jnp.float32).reshape(B)
    w1 = w1.astype(jnp.float32)
    b1 = b1.astype(jnp.float32)
    w2 = w2.astype(jnp.float32)
    b2 = b2.astype(jnp.float32)

    # Pad only to a whole number of (8,128) vregs; waste is bounded by 1023 elems.
    Bp = _round_up(B, SUBLANE * LANE)
    if Bp != B:
        xf = jnp.pad(xf, (0, Bp - B))
    rows = Bp // LANE                       # multiple of 8
    x2d = xf.reshape(rows, LANE)            # dense (sublane, lane) layout

    # ~10 flops and 8 bytes of HBM traffic per element; no transcendentals.
    cost = pl.CostEstimate(flops=10 * Bp, transcendentals=0, bytes_accessed=8 * Bp)

    smem_spec = pl.BlockSpec(memory_space=pltpu.MemorySpace.SMEM)
    vmem_full = pl.BlockSpec(memory_space=pltpu.MemorySpace.VMEM)

    if rows <= tile_rows:
        # Small input (< ~2 MiB): single full-extent block, no grid bookkeeping.
        out2d = pl.pallas_call(
            mlp_kernel,
            out_shape=jax.ShapeDtypeStruct((rows, LANE), jnp.float32),
            in_specs=[smem_spec, smem_spec, smem_spec, smem_spec, vmem_full],
            out_specs=vmem_full,
            cost_estimate=cost,
        )(w1, b1, w2, b2, x2d)
    else:
        # Large batch: 2 MiB (tile_rows, 128) blocks, lane+sublane dense.
        # pl.cdiv grid: the last block may be partial (masked writes) so no
        # extra padding / wasted HBM traffic beyond the 1024 boundary.
        # "parallel" lets megacore / v7x's two TensorCores split the batch.
        grid_b = pl.cdiv(rows, tile_rows)
        out2d = pl.pallas_call(
            mlp_kernel,
            out_shape=jax.ShapeDtypeStruct((rows, LANE), jnp.float32),
            grid=(grid_b,),
            in_specs=[smem_spec, smem_spec, smem_spec, smem_spec,
                      pl.BlockSpec((tile_rows, LANE), lambda i: (i, 0))],
            out_specs=pl.BlockSpec((tile_rows, LANE), lambda i: (i, 0)),
            compiler_params=pltpu.CompilerParams(
                dimension_semantics=("parallel",)),
            cost_estimate=cost,
        )(w1, b1, w2, b2, x2d)

    # If B % 1024 == 0 the slice is a no-op and the reshape is free.
    out = out2d.reshape(Bp)[:B].reshape(B, OUTPUT_SIZE)
    return out.astype(orig_dtype)


def init_params(key):
    """Deterministic init mimicking PyTorch nn.Linear default (uniform +-1/sqrt(fan_in))."""
    k1, k2, k3, k4 = jax.random.split(key, 4)
    bound1 = 1.0 / (INPUT_SIZE ** 0.5)
    bound2 = 1.0 / (LAYER_SIZE ** 0.5)
    w1 = jax.random.uniform(k1, (INPUT_SIZE, LAYER_SIZE), jnp.float32, -bound1, bound1)
    b1 = jax.random.uniform(k2, (1, LAYER_SIZE), jnp.float32, -bound1, bound1)
    w2 = jax.random.uniform(k3, (LAYER_SIZE, OUTPUT_SIZE), jnp.float32, -bound2, bound2)
    b2 = jax.random.uniform(k4, (1, OUTPUT_SIZE), jnp.float32, -bound2, bound2)
    return w1, b1, w2, b2


if __name__ == "__main__":
    key = jax.random.PRNGKey(0)
    k_x, k_x2, k_p = jax.random.split(key, 3)
    w1, b1, w2, b2 = init_params(k_p)

    def ref_fn(xx):
        return jnp.maximum(xx @ w1 + b1, 0.0) @ w2 + b2

    # 1) Small batch -> single full-block (no-grid) path.
    batch = 8
    x_small = jax.random.normal(k_x, (batch, INPUT_SIZE), dtype=jnp.float32)
    out_small = jax.block_until_ready(neural_network_forward(x_small, w1, b1, w2, b2))
    assert out_small.shape == (batch, OUTPUT_SIZE)
    assert jnp.allclose(out_small, ref_fn(x_small), atol=1e-5, rtol=1e-5)

    # 2) Larger batch with a deliberately small tile so the gridded "parallel"
    #    path (including a masked partial last block) is exercised cheaply.
    batch2 = 7000
    x_big = jax.random.normal(k_x2, (batch2, INPUT_SIZE), dtype=jnp.float32)
    out_big = jax.block_until_ready(
        neural_network_forward(x_big, w1, b1, w2, b2, tile_rows=16))
    assert out_big.shape == (batch2, OUTPUT_SIZE)
    assert jnp.allclose(out_big, ref_fn(x_big), atol=1e-5, rtol=1e-5)

    print("KERNEL_OK")
</pallas_src>

<mosaic_0001>
module attributes {stable_mosaic.version = 11 : i64} {
  func.func @mlp_kernel(%arg0: memref<1x2xf32, #tpu.memory_space<smem>>, %arg1: memref<1x2xf32, #tpu.memory_space<smem>>, %arg2: memref<2x1xf32, #tpu.memory_space<smem>>, %arg3: memref<1x1xf32, #tpu.memory_space<smem>>, %arg4: memref<8x128xf32, #tpu.memory_space<vmem>>, %arg5: memref<8x128xf32, #tpu.memory_space<vmem>>) attributes {dimension_semantics = [], scalar_prefetch = 0 : i64, scratch_operands = 0 : i64, tpu.core_type = #tpu.core_type<tc>} {
    %c0 = arith.constant 0 : index
    %c0_0 = arith.constant 0 : index
    %0 = vector.load %arg4[%c0, %c0_0] : memref<8x128xf32, #tpu.memory_space<vmem>>, vector<8x128xf32>
    %c0_1 = arith.constant 0 : index
    %c0_2 = arith.constant 0 : index
    %1 = memref.load %arg3[%c0_1, %c0_2] : memref<1x1xf32, #tpu.memory_space<smem>>
    %2 = vector.broadcast %1 : f32 to vector<8x128xf32>
    %c0_3 = arith.constant 0 : index
    %c0_4 = arith.constant 0 : index
    %3 = memref.load %arg0[%c0_3, %c0_4] : memref<1x2xf32, #tpu.memory_space<smem>>
    %4 = vector.broadcast %3 : f32 to vector<8x128xf32>
    %5 = arith.mulf %0, %4 : vector<8x128xf32>
    %c0_5 = arith.constant 0 : index
    %c0_6 = arith.constant 0 : index
    %6 = memref.load %arg1[%c0_5, %c0_6] : memref<1x2xf32, #tpu.memory_space<smem>>
    %7 = vector.broadcast %6 : f32 to vector<8x128xf32>
    %8 = arith.addf %5, %7 : vector<8x128xf32>
    %cst = arith.constant 0.000000e+00 : f32
    %9 = vector.broadcast %cst : f32 to vector<8x128xf32>
    %10 = arith.maximumf %8, %9 : vector<8x128xf32>
    %c0_7 = arith.constant 0 : index
    %c0_8 = arith.constant 0 : index
    %11 = memref.load %arg2[%c0_7, %c0_8] : memref<2x1xf32, #tpu.memory_space<smem>>
    %12 = vector.broadcast %11 : f32 to vector<8x128xf32>
    %13 = arith.mulf %10, %12 : vector<8x128xf32>
    %14 = arith.addf %2, %13 : vector<8x128xf32>
    %c0_9 = arith.constant 0 : index
    %c1 = arith.constant 1 : index
    %15 = memref.load %arg0[%c0_9, %c1] : memref<1x2xf32, #tpu.memory_space<smem>>
    %16 = vector.broadcast %15 : f32 to vector<8x128xf32>
    %17 = arith.mulf %0, %16 : vector<8x128xf32>
    %c0_10 = arith.constant 0 : index
    %c1_11 = arith.constant 1 : index
    %18 = memref.load %arg1[%c0_10, %c1_11] : memref<1x2xf32, #tpu.memory_space<smem>>
    %19 = vector.broadcast %18 : f32 to vector<8x128xf32>
    %20 = arith.addf %17, %19 : vector<8x128xf32>
    %cst_12 = arith.constant 0.000000e+00 : f32
    %21 = vector.broadcast %cst_12 : f32 to vector<8x128xf32>
    %22 = arith.maximumf %20, %21 : vector<8x128xf32>
    %c1_13 = arith.constant 1 : index
    %c0_14 = arith.constant 0 : index
    %23 = memref.load %arg2[%c1_13, %c0_14] : memref<2x1xf32, #tpu.memory_space<smem>>
    %24 = vector.broadcast %23 : f32 to vector<8x128xf32>
    %25 = arith.mulf %22, %24 : vector<8x128xf32>
    %26 = arith.addf %14, %25 : vector<8x128xf32>
    %c0_15 = arith.constant 0 : index
    %c0_16 = arith.constant 0 : index
    %27 = vector.load %arg5[%c0_15, %c0_16] : memref<8x128xf32, #tpu.memory_space<vmem>>, vector<8x128xf32>
    tpu.vector_store %arg5[%c0_15, %c0_16], %26 {strides = array<i32>} : memref<8x128xf32, #tpu.memory_space<vmem>>, vector<8x128xf32>,
    return
  }
}

</mosaic_0001>

<bundles_post_ra>
// kernel: tpu_custom_call.1
= control target key start
LH: loop header
LB: loop body
LE: loop exit
PB: predicated region body
PF: predicated region fallthrough
CT: control target
= control target key end

     0   :  { %11 = vsyncpa [#allocation6], 0  ;;  %s270_s0 = inlined_call_operand.vmem [shape: f32[1,2], index: 0, kind: input, shape index: {}]   ;;  %s271_s1 = inlined_call_operand.vmem [shape: f32[1,2], index: 1, kind: input, shape index: {}]   ;;  %s272_s2 = inlined_call_operand.vmem [shape: f32[2,1], index: 2, kind: input, shape index: {}]   ;;  %s273_s3 = inlined_call_operand.<no memory space> [shape: f32[1,1], index: 3, kind: input, shape index: {}]   ;;  %s274_s4 = inlined_call_operand.hbm [shape: f32[8,128], index: 4, kind: input, shape index: {}]   ;;  %s275_s5 = inlined_call_operand.hbm [shape: f32[8,128], index: 5, kind: output, shape index: {}]  }
   0x1   :  { %12 = vsyncpa [#allocation8], 0 }
   0x2   :  { %13 = vsyncpa [#allocation4], 0  ;;  %s29_s20 = sshll.u32 %s271_s1, 4  ;;  %s30_s20 = int_to_ptr.vmem [resolvable:$true] %s29_s20 }
   0x3   :  { %14 = vsyncpa [#allocation5], 0  ;;  %s20_s23 = sshll.u32 %s270_s0, 4  ;;  %s217_s24 = smov [#allocation7]   ;;  %s21_s23 = int_to_ptr.vmem [resolvable:$true] %s20_s23 }
   0x4   :  { %32 = dma.vmem_to_smem %s30_s20, 16, %s217_s24, [#allocation8]  }
   0x5   :  { %s218_s25 = smov [#allocation3]   ;;  %s38_s28 = sshll.u32 %s272_s2, 4  ;;  %s39_s28 = int_to_ptr.vmem [resolvable:$true] %s38_s28 }
   0x6   :  { %23 = dma.vmem_to_smem %s21_s23, 16, %s218_s25, [#allocation6]  }
   0x7   :  { %s49_s1 = sshll.u32 %s274_s4, 4  ;;  %s219_s6 = smov [#allocation9]   ;;  %s50_s1 = int_to_ptr.hbm [resolvable:$true] %s49_s1 }
   0x8   :  { %41 = dma.vmem_to_smem %s39_s28, 32, %s219_s6, [#allocation8]  }
   0x9   :  { %s220_s7 = smov [#allocation10]  }
   0xa   :  { %s51_s8 = sshll.u32 %s220_s7, 4  ;;  %s52_s8 = int_to_ptr.vmem [resolvable:$true] %s51_s8 }
   0xb   :  { %54 = dma.hbm_to_vmem [thread:$0]  %s50_s1, 128, %s52_s8, [#allocation4]  }
   0xc   :  { %209 = dma.done.wait [#allocation6], 16  }
   0xd   :  { %210 = vsyncadd [#allocation6], 4294967280 }
   0xe   :  { %211 = dma.done.wait [#allocation8], 48  }
   0xf   :  { %212 = vsyncadd [#allocation8], 4294967248 }
  0x10   :  { %213 = dma.done.wait [#allocation4], 128  }
  0x11   :  { %214 = vsyncadd [#allocation4], 4294967168 }
  0x12   :  { %71 = sfence }
  0x13   :  { %s75_s0 = sld [smem:[#allocation3]]  ;;  %v72_v0 = vld [vmem:[#allocation10] sm:$0xff]  ;;  %v74_v10 = vstv %s273_s3  ;;  %s221_s14 = smov [#allocation11]  }
  0x14   :  { %s78_s2 = sld [smem:[#allocation7]]  ;;  %s103_s15 = sshll.u32 %s221_s14, 4  ;;  %s104_s15 = int_to_ptr.vmem [resolvable:$true] %s103_s15 }
  0x15   :  { %s82_s9 = sld [smem:[#allocation9]]  ;;  %s105_s18 = sshll.u32 %s275_s5, 4  ;;  %s106_s18 = int_to_ptr.hbm [resolvable:$true] %s105_s18 }
  0x16   :  { %s117_s10 = sld [smem:[#allocation3 + $0x1]] }
  0x17   :  { %s118_s4 = sld [smem:[#allocation7 + $0x1]] }
  0x18   :  { %s119_s11 = sld [smem:[#allocation9 + $0x80]] }
  0x19   :  { %v76_v1 = vstv %s75_s0 }
  0x1a   :  { %v77_v2 = vmul.f32 %v76_v1, %v72_v0  ;;  %v79_v3 = vstv %s78_s2 }
  0x1b   :  { %v83_v6 = vstv %s82_s9 }
  0x1c   :  { %v80_v4 = vadd.f32 %v79_v3, %v77_v2  ;;  %v87_v5 = vstv %s117_s10 }
  0x1d   :  { %v88_v7 = vmul.f32 %v87_v5, %v72_v0  ;;  %v90_v8 = vstv %s118_s4 }
  0x1e   :  { %v81_v9 = vmax.f32 %v80_v4, 0.0  ;;  %v94_v13 = vstv %s119_s11 }
  0x1f   :  { %v91_v11 = vadd.f32 %v90_v8, %v88_v7 }
  0x20   :  { %v84_v12 = vmul.f32 %v83_v6, %v81_v9 }
  0x21   :  { %v92_v14 = vmax.f32 %v91_v11, 0.0 }
  0x22   :  { %v85_v15 = vadd.f32 %v84_v12, %v74_v10 }
  0x23   :  { %v95_v16 = vmul.f32 %v94_v13, %v92_v14 }
  0x25   :  { %v96_v17 = vadd.f32 %v95_v16, %v85_v15 }
  0x27   :  { %97 = vst [vmem:[#allocation11] sm:$0xff] %v96_v17 }
  0x28   :  { %108 = dma.vmem_to_hbm [thread:$0]  %s104_s15, 128, %s106_s18, [#allocation5]  }
  0x29   :  { %215 = dma.done.wait [#allocation5], 128  }
  0x2a   :  { %216 = vsyncadd [#allocation5], 4294967168 }
  0x2b   :  { %113 = vsyncpa [#allocation4], 1 }
  0x2c   :  { %114 = vsyncpa [#allocation5], 1 }
  0x2d   :  { %115 = vsyncpa [#allocation6], 1 }
  0x2e   :  { %116 = vsyncpa [#allocation8], 1 }

</bundles_post_ra>
